<compile_context>
chip_gen: v6e
topology: v6e:2x2x1
jax: 0.10.0
libtpu: 0.0.40
codegen_flags: <defaults>
</compile_context>

<pallas_src>
import functools

import jax
import jax.numpy as jnp
from jax.experimental import pallas as pl
from jax.experimental.pallas import tpu as pltpu

_LANES = 128


# --------------------------------------------------------------------------
# Streaming path: one batch row per grid row, spatial axis streamed in
# lane-aligned chunks with resident per-lane accumulators.
# --------------------------------------------------------------------------
def _stream_kernel(x_ref, w1_ref, b1_ref, w2_ref, b2_ref, out_ref,
                   sum_acc, max_acc, *, hw, t_hw, c_tile, unroll):
    # x_ref:   (C, t_hw) chunk of one batch row (native dtype)
    # w1_ref:  (mid, C)   b1_ref: (mid, 1)   (PyTorch Linear layout)
    # w2_ref:  (C, mid)   b2_ref: (C, 1)
    # out_ref: (C, 1)     sum_acc / max_acc: (C, 128) f32 scratch
    k = pl.program_id(1)
    n_k = pl.num_programs(1)
    c_total = sum_acc.shape[0]
    lanes = sum_acc.shape[1]

    @pl.when(k == 0)
    def _init():
        sum_acc[...] = jnp.zeros_like(sum_acc)
        max_acc[...] = jnp.full_like(max_acc, -jnp.inf)

    def accumulate(n_full, n_partial):
        # n_full:    fully valid 128-lane groups in this chunk (static)
        # n_partial: valid lanes of the following group, 0 => none (static)
        for c0 in range(0, c_total, c_tile):
            cs = min(c_tile, c_total - c0)
            acc_s = sum_acc[pl.ds(c0, cs), :]
            acc_m = max_acc[pl.ds(c0, cs), :]
            if n_full > 0:
                def body(g, carry):
                    s, m = carry
                    start = pl.multiple_of(g * lanes, lanes)
                    sl = x_ref[pl.ds(c0, cs),
                               pl.ds(start, lanes)].astype(jnp.float32)
                    return s + sl, jnp.maximum(m, sl)
                acc_s, acc_m = jax.lax.fori_loop(
                    0, n_full, body, (acc_s, acc_m),
                    unroll=min(unroll, n_full))
            if n_partial > 0:
                # Single partially-valid group of the ragged tail; groups
                # beyond the tail are never loaded at all.
                sl = x_ref[pl.ds(c0, cs),
                           pl.ds(n_full * lanes, lanes)].astype(jnp.float32)
                lane = jax.lax.broadcasted_iota(jnp.int32, sl.shape, 1)
                valid = lane < n_partial
                acc_s = acc_s + jnp.where(valid, sl, 0.0)
                acc_m = jnp.maximum(acc_m, jnp.where(valid, sl, -jnp.inf))
            sum_acc[pl.ds(c0, cs), :] = acc_s
            max_acc[pl.ds(c0, cs), :] = acc_m

    n_groups = t_hw // lanes
    tail = hw % t_hw  # static; nonzero => last chunk is ragged

    if tail == 0:
        accumulate(n_groups, 0)
    else:
        # Unmasked fast path for every full chunk; mask only on the last step.
        @pl.when(k < n_k - 1)
        def _steady():
            accumulate(n_groups, 0)

        @pl.when(k == n_k - 1)
        def _ragged():
            accumulate(tail // lanes, tail % lanes)

    @pl.when(k == n_k - 1)
    def _finalize():
        # Single cross-lane reduce per output, once per batch row.
        avg = jnp.sum(sum_acc[...], axis=-1, keepdims=True) * (1.0 / hw)  # (C,1)
        mx = jnp.max(max_acc[...], axis=-1, keepdims=True)                # (C,1)
        p = jnp.concatenate([avg, mx], axis=1)                            # (C,2)

        w1 = w1_ref[...].astype(jnp.float32)
        b1 = b1_ref[...].astype(jnp.float32)
        w2 = w2_ref[...].astype(jnp.float32)
        b2 = b2_ref[...].astype(jnp.float32)

        # Fused shared MLP over both pooled vectors in one 2-column pass;
        # summing the two columns == mlp(avg) + mlp(mx) (b2 counted twice,
        # exactly as in the reference).
        h = jnp.maximum(
            jnp.dot(w1, p, preferred_element_type=jnp.float32) + b1, 0.0)  # (mid,2)
        o = jnp.dot(w2, h, preferred_element_type=jnp.float32) + b2        # (C,2)
        logits = o[:, 0:1] + o[:, 1:2]
        out_ref[...] = jax.nn.sigmoid(logits).astype(out_ref.dtype)


# --------------------------------------------------------------------------
# Fused path: several whole rows per grid step (small images / many rows).
# --------------------------------------------------------------------------
def _fused_kernel(x_ref, w1t_ref, b1_ref, w2t_ref, b2_ref, out_ref, *, hw):
    # x_ref:   (b_tile, C, HW) whole batch rows (native dtype)
    # w1t_ref: (C, mid)   b1_ref: (1, mid)   (transposed Linear weights)
    # w2t_ref: (mid, C)   b2_ref: (1, C)
    # out_ref: (b_tile, 1, C)
    bt = out_ref.shape[0]
    x = x_ref[...]
    avg = jnp.sum(x.astype(jnp.float32), axis=-1) * (1.0 / hw)   # (bt, C)
    mx = jnp.max(x, axis=-1).astype(jnp.float32)                 # (bt, C)
    p = jnp.concatenate([avg, mx], axis=0)                       # (2*bt, C)

    w1t = w1t_ref[...].astype(jnp.float32)
    b1 = b1_ref[...].astype(jnp.float32)
    w2t = w2t_ref[...].astype(jnp.float32)
    b2 = b2_ref[...].astype(jnp.float32)

    h = jnp.maximum(
        jnp.dot(p, w1t, preferred_element_type=jnp.float32) + b1, 0.0)   # (2bt, mid)
    o = jnp.dot(h, w2t, preferred_element_type=jnp.float32) + b2         # (2bt, C)
    logits = o[:bt, :] + o[bt:, :]                                       # (bt, C)
    sig = jax.nn.sigmoid(logits).astype(out_ref.dtype)                   # (bt, C)
    # Per-row stores avoid any minor-dim reshape; bt is small & static.
    for r in range(bt):
        out_ref[r] = sig[r:r + 1, :]


# --------------------------------------------------------------------------
# Wrapper
# --------------------------------------------------------------------------
def _compiler_params(semantics, x_block_bytes):
    need = 2 * x_block_bytes + (2 << 20)  # double-buffered x + headroom
    kwargs = dict(dimension_semantics=semantics)
    if need > 16 * 1024 * 1024:  # beyond v5e's scoped default -> be explicit
        kwargs["vmem_limit_bytes"] = int(need)
    return pltpu.CompilerParams(**kwargs)


def channel_attention(x, w1, b1, w2, b2, *, target_chunk_bytes=4 * 1024 * 1024):
    """x: (B, C, H, W) NCHW.  w1: (mid, C), b1: (mid,), w2: (C, mid), b2: (C,)
    (PyTorch nn.Linear weight layout).  Returns (B, C, 1, 1)."""
    B, C, H, W = x.shape
    mid = w1.shape[0]
    HW = H * W
    itemsize = jnp.dtype(x.dtype).itemsize
    x_flat = x.reshape(B, C, HW)

    row_bytes = C * HW * itemsize
    # Largest lane-aligned spatial chunk within the byte budget (>= 128).
    cap = max(_LANES, (target_chunk_bytes // (C * itemsize)) // _LANES * _LANES)

    cost = pl.CostEstimate(
        flops=int(2 * B * C * HW + 8 * B * C * mid),
        transcendentals=int(B * C),
        bytes_accessed=int(B * C * HW * itemsize + B * C * itemsize
                           + (w1.size + b1.size + w2.size + b2.size)
                           * jnp.dtype(w1.dtype).itemsize),
    )

    if HW <= cap:
        # ---- Fused path: whole rows per grid step, fold batch rows. ----
        b_tile = int(max(1, min(B, target_chunk_bytes // max(row_bytes, 1))))
        n_b = pl.cdiv(B, b_tile)
        kernel = functools.partial(_fused_kernel, hw=HW)
        out = pl.pallas_call(
            kernel,
            out_shape=jax.ShapeDtypeStruct((B, 1, C), x.dtype),
            grid_spec=pltpu.PrefetchScalarGridSpec(
                num_scalar_prefetch=0,
                grid=(n_b,),
                in_specs=[
                    pl.BlockSpec((b_tile, C, HW), lambda b: (b, 0, 0)),
                    # Parameters: constant index maps -> VMEM-resident.
                    pl.BlockSpec((C, mid), lambda b: (0, 0)),
                    pl.BlockSpec((1, mid), lambda b: (0, 0)),
                    pl.BlockSpec((mid, C), lambda b: (0, 0)),
                    pl.BlockSpec((1, C), lambda b: (0, 0)),
                ],
                out_specs=pl.BlockSpec((b_tile, 1, C), lambda b: (b, 0, 0)),
            ),
            compiler_params=_compiler_params(("parallel",), b_tile * row_bytes),
            cost_estimate=cost,
        )(x_flat, w1.T, b1.reshape(1, mid), w2.T, b2.reshape(1, C))
        return out.reshape(B, C, 1, 1)

    # ---- Streaming path: lane-aligned chunks of one row per grid step. ----
    t_hw = cap
    n_k = pl.cdiv(HW, t_hw)
    c_tile = min(C, 128)  # bounds fori_loop carries to <= 32 vregs
    kernel = functools.partial(_stream_kernel, hw=HW, t_hw=t_hw,
                               c_tile=c_tile, unroll=8)
    out = pl.pallas_call(
        kernel,
        out_shape=jax.ShapeDtypeStruct((B, C, 1), x.dtype),
        grid_spec=pltpu.PrefetchScalarGridSpec(
            num_scalar_prefetch=0,
            grid=(B, n_k),
            in_specs=[
                pl.BlockSpec((pl.Squeezed(), C, t_hw), lambda b, k: (b, 0, k)),
                pl.BlockSpec((mid, C), lambda b, k: (0, 0)),
                pl.BlockSpec((mid, 1), lambda b, k: (0, 0)),
                pl.BlockSpec((C, mid), lambda b, k: (0, 0)),
                pl.BlockSpec((C, 1), lambda b, k: (0, 0)),
            ],
            # Same output block across k -> resident, written only at finalize.
            out_specs=pl.BlockSpec((pl.Squeezed(), C, 1), lambda b, k: (b, 0, 0)),
            scratch_shapes=[
                pltpu.VMEM((C, _LANES), jnp.float32),  # running sum
                pltpu.VMEM((C, _LANES), jnp.float32),  # running max
            ],
        ),
        compiler_params=_compiler_params(("parallel", "arbitrary"),
                                         C * t_hw * itemsize),
        cost_estimate=cost,
    )(x_flat, w1, b1.reshape(mid, 1), w2, b2.reshape(C, 1))
    return out.reshape(B, C, 1, 1)


def _reference(x, w1, b1, w2, b2):
    B, C, H, W = x.shape
    avg = jnp.mean(x, axis=(2, 3))
    mx = jnp.max(x, axis=(2, 3))

    def mlp(p):
        h = jnp.maximum(p @ w1.T + b1, 0.0)
        return h @ w2.T + b2

    return jax.nn.sigmoid(mlp(avg) + mlp(mx)).reshape(B, C, 1, 1)


if __name__ == "__main__":
    # Module config: channel=64, reduction=16 -> mid_channel=4
    B, C, H, W = 2, 64, 16, 16
    reduction = 16
    mid = C // reduction

    key = jax.random.PRNGKey(0)
    kx, k1, k2, k3, k4 = jax.random.split(key, 5)

    x = jax.random.normal(kx, (B, C, H, W), dtype=jnp.float32)
    # PyTorch nn.Linear weight layout: [out_features, in_features].
    w1 = jax.random.normal(k1, (mid, C), dtype=jnp.float32) * 0.1
    b1 = jax.random.normal(k2, (mid,), dtype=jnp.float32) * 0.1
    w2 = jax.random.normal(k3, (C, mid), dtype=jnp.float32) * 0.1
    b2 = jax.random.normal(k4, (C,), dtype=jnp.float32) * 0.1

    ref = _reference(x, w1, b1, w2, b2)

    # 1) Fused path (default ~4 MiB budget -> both rows in one grid step).
    out1 = jax.block_until_ready(channel_attention(x, w1, b1, w2, b2))
    assert out1.shape == (B, C, 1, 1)
    assert jnp.allclose(out1, ref, atol=1e-5, rtol=1e-5)

    # 2) Streaming path: tiny chunk budget -> t_hw = 128, 2 chunks per row.
    out2 = jax.block_until_ready(
        channel_attention(x, w1, b1, w2, b2, target_chunk_bytes=32 * 1024))
    assert jnp.allclose(out2, ref, atol=1e-5, rtol=1e-5)

    # 3) Streaming path with ragged tail: HW = 18*18 = 324 (not % 128),
    #    masked only on the last k step.
    x3 = jax.random.normal(kx, (2, C, 18, 18), dtype=jnp.float32)
    ref3 = _reference(x3, w1, b1, w2, b2)
    out3 = jax.block_until_ready(
        channel_attention(x3, w1, b1, w2, b2, target_chunk_bytes=32 * 1024))
    assert jnp.allclose(out3, ref3, atol=1e-5, rtol=1e-5)

    # 4) Fused path with HW < 128 (non-lane-aligned reduce).
    x4 = jax.random.normal(kx, (2, C, 5, 5), dtype=jnp.float32)
    ref4 = _reference(x4, w1, b1, w2, b2)
    out4 = jax.block_until_ready(channel_attention(x4, w1, b1, w2, b2))
    assert jnp.allclose(out4, ref4, atol=1e-5, rtol=1e-5)

    # 5) Fused path with a padded final batch block (B=3, b_tile=2).
    x5 = jax.random.normal(kx, (3, C, 16, 16), dtype=jnp.float32)
    ref5 = _reference(x5, w1, b1, w2, b2)
    out5 = jax.block_until_ready(
        channel_attention(x5, w1, b1, w2, b2, target_chunk_bytes=128 * 1024))
    assert jnp.allclose(out5, ref5, atol=1e-5, rtol=1e-5)

    print("KERNEL_OK")
</pallas_src>

<mosaic_0001>
module attributes {stable_mosaic.version = 11 : i64} {
  func.func @_fused_kernel(%arg0: i32, %arg1: memref<2x64x256xf32, #tpu.memory_space<vmem>>, %arg2: memref<64x4xf32, #tpu.memory_space<vmem>>, %arg3: memref<1x4xf32, #tpu.memory_space<vmem>>, %arg4: memref<4x64xf32, #tpu.memory_space<vmem>>, %arg5: memref<1x64xf32, #tpu.memory_space<vmem>>, %arg6: memref<2x1x64xf32, #tpu.memory_space<vmem>>) attributes {dimension_semantics = [#tpu.dimension_semantics<parallel>], iteration_bounds = array<i64: 1>, scalar_prefetch = 0 : i64, scratch_operands = 0 : i64, tpu.core_type = #tpu.core_type<tc>, window_params = [{transform_indices = @transform_0, window_bounds = array<i64: 2, 64, 256>}, {pipeline_mode = #tpu.pipeline_mode<synchronous>, transform_indices = @transform_1, window_bounds = array<i64: 64, 4>}, {pipeline_mode = #tpu.pipeline_mode<synchronous>, transform_indices = @transform_2, window_bounds = array<i64: 1, 4>}, {pipeline_mode = #tpu.pipeline_mode<synchronous>, transform_indices = @transform_3, window_bounds = array<i64: 4, 64>}, {pipeline_mode = #tpu.pipeline_mode<synchronous>, transform_indices = @transform_4, window_bounds = array<i64: 1, 64>}, {transform_indices = @transform_5, window_bounds = array<i64: 2, 1, 64>}]} {
    %c0 = arith.constant 0 : index
    %c0_0 = arith.constant 0 : index
    %c0_1 = arith.constant 0 : index
    %0 = vector.load %arg1[%c0, %c0_0, %c0_1] : memref<2x64x256xf32, #tpu.memory_space<vmem>>, vector<2x64x256xf32>
    %cst = arith.constant dense<0.000000e+00> : vector<2x64xf32>
    %1 = vector.multi_reduction <add>, %0, %cst [2] : vector<2x64x256xf32> to vector<2x64xf32>
    %cst_2 = arith.constant 3.906250e-03 : f32
    %2 = vector.broadcast %cst_2 : f32 to vector<2x64xf32>
    %3 = arith.mulf %1, %2 : vector<2x64xf32>
    %cst_3 = arith.constant dense<0xFF800000> : vector<2x64xf32>
    %4 = vector.multi_reduction <maximumf>, %0, %cst_3 [2] : vector<2x64x256xf32> to vector<2x64xf32>
    %5 = tpu.concatenate %3, %4 in 0 : vector<2x64xf32>, vector<2x64xf32> -> vector<4x64xf32>
    %c0_4 = arith.constant 0 : index
    %c0_5 = arith.constant 0 : index
    %6 = vector.load %arg2[%c0_4, %c0_5] : memref<64x4xf32, #tpu.memory_space<vmem>>, vector<64x4xf32>
    %c0_6 = arith.constant 0 : index
    %c0_7 = arith.constant 0 : index
    %7 = vector.load %arg3[%c0_6, %c0_7] : memref<1x4xf32, #tpu.memory_space<vmem>>, vector<1x4xf32>
    %c0_8 = arith.constant 0 : index
    %c0_9 = arith.constant 0 : index
    %8 = vector.load %arg4[%c0_8, %c0_9] : memref<4x64xf32, #tpu.memory_space<vmem>>, vector<4x64xf32>
    %c0_10 = arith.constant 0 : index
    %c0_11 = arith.constant 0 : index
    %9 = vector.load %arg5[%c0_10, %c0_11] : memref<1x64xf32, #tpu.memory_space<vmem>>, vector<1x64xf32>
    %cst_12 = arith.constant dense<0.000000e+00> : vector<4x4xf32>
    %10 = tpu.matmul %5, %6, %cst_12 {dimension_numbers = #tpu.dot_dimension_numbers<[1], [0], [0], [1], [0, 0, 1, 1], [], []>} : vector<4x64xf32>, vector<64x4xf32>, vector<4x4xf32> -> vector<4x4xf32>
    %11 = vector.broadcast %7 : vector<1x4xf32> to vector<4x4xf32>
    %12 = arith.addf %10, %11 : vector<4x4xf32>
    %cst_13 = arith.constant 0.000000e+00 : f32
    %13 = vector.broadcast %cst_13 : f32 to vector<4x4xf32>
    %14 = arith.maximumf %12, %13 : vector<4x4xf32>
    %cst_14 = arith.constant dense<0.000000e+00> : vector<4x64xf32>
    %15 = tpu.matmul %14, %8, %cst_14 {dimension_numbers = #tpu.dot_dimension_numbers<[1], [0], [0], [1], [0, 0, 1, 1], [], []>} : vector<4x4xf32>, vector<4x64xf32>, vector<4x64xf32> -> vector<4x64xf32>
    %16 = vector.broadcast %9 : vector<1x64xf32> to vector<4x64xf32>
    %17 = arith.addf %15, %16 : vector<4x64xf32>
    %18 = vector.extract_strided_slice %17 {offsets = [0, 0], sizes = [2, 64], strides = [1, 1]} : vector<4x64xf32> to vector<2x64xf32>
    %19 = vector.extract_strided_slice %17 {offsets = [2, 0], sizes = [2, 64], strides = [1, 1]} : vector<4x64xf32> to vector<2x64xf32>
    %20 = arith.addf %18, %19 : vector<2x64xf32>
    %21 = arith.negf %20 : vector<2x64xf32>
    %22 = math.exp %21 : vector<2x64xf32>
    %cst_15 = arith.constant 1.000000e+00 : f32
    %23 = vector.broadcast %cst_15 : f32 to vector<2x64xf32>
    %24 = arith.addf %23, %22 : vector<2x64xf32>
    %25 = arith.divf %23, %24 : vector<2x64xf32>
    %26 = vector.extract_strided_slice %25 {offsets = [0, 0], sizes = [1, 64], strides = [1, 1]} : vector<2x64xf32> to vector<1x64xf32>
    %c0_16 = arith.constant 0 : index
    %c0_17 = arith.constant 0 : index
    %c0_18 = arith.constant 0 : index
    %27 = vector.load %arg6[%c0_16, %c0_17, %c0_18] : memref<2x1x64xf32, #tpu.memory_space<vmem>>, vector<1x1x64xf32>
    %28 = vector.shape_cast %27 : vector<1x1x64xf32> to vector<1x64xf32>
    %29 = vector.shape_cast %26 : vector<1x64xf32> to vector<1x1x64xf32>
    tpu.vector_store %arg6[%c0_16, %c0_17, %c0_18], %29 {strides = array<i32>} : memref<2x1x64xf32, #tpu.memory_space<vmem>>, vector<1x1x64xf32>,
    %30 = vector.extract_strided_slice %25 {offsets = [1, 0], sizes = [1, 64], strides = [1, 1]} : vector<2x64xf32> to vector<1x64xf32>
    %c1 = arith.constant 1 : index
    %c0_19 = arith.constant 0 : index
    %c0_20 = arith.constant 0 : index
    %31 = vector.load %arg6[%c1, %c0_19, %c0_20] : memref<2x1x64xf32, #tpu.memory_space<vmem>>, vector<1x1x64xf32>
    %32 = vector.shape_cast %31 : vector<1x1x64xf32> to vector<1x64xf32>
    %33 = vector.shape_cast %30 : vector<1x64xf32> to vector<1x1x64xf32>
    tpu.vector_store %arg6[%c1, %c0_19, %c0_20], %33 {strides = array<i32>} : memref<2x1x64xf32, #tpu.memory_space<vmem>>, vector<1x1x64xf32>,
    return
  }
  func.func @transform_0(%arg0: i32) -> (i32, i32, i32) {
    %c0_i32 = arith.constant 0 : i32
    %c0_i32_0 = arith.constant 0 : i32
    %c0_i32_1 = arith.constant 0 : i32
    return %arg0, %c0_i32, %c0_i32_0 : i32, i32, i32
  }
  func.func @transform_1(%arg0: i32) -> (i32, i32) {
    %c0_i32 = arith.constant 0 : i32
    %c0_i32_0 = arith.constant 0 : i32
    %c0_i32_1 = arith.constant 0 : i32
    return %c0_i32, %c0_i32_0 : i32, i32
  }
  func.func @transform_2(%arg0: i32) -> (i32, i32) {
    %c0_i32 = arith.constant 0 : i32
    %c0_i32_0 = arith.constant 0 : i32
    %c0_i32_1 = arith.constant 0 : i32
    return %c0_i32, %c0_i32_0 : i32, i32
  }
  func.func @transform_3(%arg0: i32) -> (i32, i32) {
    %c0_i32 = arith.constant 0 : i32
    %c0_i32_0 = arith.constant 0 : i32
    %c0_i32_1 = arith.constant 0 : i32
    return %c0_i32, %c0_i32_0 : i32, i32
  }
  func.func @transform_4(%arg0: i32) -> (i32, i32) {
    %c0_i32 = arith.constant 0 : i32
    %c0_i32_0 = arith.constant 0 : i32
    %c0_i32_1 = arith.constant 0 : i32
    return %c0_i32, %c0_i32_0 : i32, i32
  }
  func.func @transform_5(%arg0: i32) -> (i32, i32, i32) {
    %c0_i32 = arith.constant 0 : i32
    %c0_i32_0 = arith.constant 0 : i32
    %c0_i32_1 = arith.constant 0 : i32
    return %arg0, %c0_i32, %c0_i32_0 : i32, i32, i32
  }
}

</mosaic_0001>

<bundles_post_ra>
// kernel: tpu_custom_call.1
= control target key start
LH: loop header
LB: loop body
LE: loop exit
PB: predicated region body
PF: predicated region fallthrough
CT: control target
= control target key end

     0   :  { %10 = vsyncpa [#allocation3], 0  ;;  %s882_s0 = inlined_call_operand.hbm [shape: f32[2,64,256], index: 0, kind: input, shape index: {}]   ;;  %s883_s1 = inlined_call_operand.vmem [shape: f32[64,4], index: 1, kind: input, shape index: {}]   ;;  %s884_s2 = inlined_call_operand.vmem [shape: f32[1,4], index: 2, kind: input, shape index: {}]   ;;  %s885_s3 = inlined_call_operand.vmem [shape: f32[4,64], index: 3, kind: input, shape index: {}]   ;;  %s886_s4 = inlined_call_operand.vmem [shape: f32[1,64], index: 4, kind: input, shape index: {}]   ;;  %s887_s5 = inlined_call_operand.hbm [shape: f32[2,1,64], index: 5, kind: output, shape index: {}]  }
   0x1   :  { %11 = vsyncpa [#allocation4], 0  ;;  %s695_s18 = smov [#allocation2]  }
   0x2   :  { %s17_s19 = sshll.u32 %s695_s18, 4  ;;  %s18_s19 = int_to_ptr.vmem [resolvable:$true] %s17_s19 }
   0x3   :  { %s659_s20 = scalar_lea.vmem %s18_s19, 4096  ;;  %p664_p1 = scmp.lt.s32.totalorder %s18_s19, %s18_s19 }
   0x4   :  { %p660_p0 = scmp.ne.s32.totalorder %s18_s19, %s659_s20  ;;  %p665_p2 = scmp.lt.s32.totalorder %s659_s20, %s659_s20 }
   0x6   :  { %p666_p3 = por %p665_p2, %p664_p1 }
   0x8   :  { %p667_p4 = pnand %p666_p3, %p660_p0 }
   0xa   :  { %670 = shalt.err (!%p667_p4)
}
   0xb   :  { %s696_s21 = smov 256   ;;  %s697_s22 = smov 16  }
   0xc   :  { %23 = dma.hbm_to_vmem [thread:$0]  %s882_s0, 4096, %s18_s19, [#allocation3], %s696_s21, %s696_s21, %s697_s22  }
   0xd   :  { %691 = dma.done.wait [#allocation3], 4096  }
   0xe   :  { %692 = vsyncadd [#allocation3], 4294963200  ;;  %v51_v0 = vld [vmem:[#allocation2 + $0x80] sm:$0xff]  ;;  %v52_v1 = vld [vmem:[#allocation2 + $0x88] sm:$0xff]  ;;  %vm699_vm0 = vmmov 0   ;;  %vm206_vm1 = vcmask 130112  }
   0xf   :  { %v35_v2 = vld [vmem:[#allocation2] sm:$0xff]  ;;  %v91_v3 = vadd.f32 %v52_v1, %v51_v0  ;;  %v36_v4 = vld [vmem:[#allocation2 + $0x8] sm:$0xff]  ;;  %v53_v5 = vld [vmem:[#allocation2 + $0x90] sm:$0xff]  ;;  %v155_v27 = vmax.f32 %v51_v0, %v52_v1  ;;  %v698_v0 = vmov 0.0   ;;  %vm213_vm2 = vcmask 195712  }
  0x10   :  { %v54_v6 = vld [vmem:[#allocation2 + $0x98] sm:$0xff]  ;;  %v67_v7 = vadd.f32 %v36_v4, %v35_v2  ;;  %v37_v8 = vld [vmem:[#allocation2 + $0x10] sm:$0xff]  ;;  %v55_v12 = vld [vmem:[#allocation2 + $0xa0] sm:$0xff]  ;;  %v131_v25 = vmax.f32 %v35_v2, %v36_v4  ;;  %616 = vmatprep.subr.mxu0 %v698_v0  ;;  %635 = vmatprep.subr.mxu1 %v698_v0  ;;  %vm220_vm3 = vcmask 261312   ;;  %vm227_vm4 = vcmask 326912  }
  0x11   :  { %v38_v9 = vld [vmem:[#allocation2 + $0x18] sm:$0xff]  ;;  %92 = vadd.xlane.f32.xlu1 %v91_v3  ;;  %v94_v10 = vadd.f32 %v54_v6, %v53_v5  ;;  %v56_v13 = vld [vmem:[#allocation2 + $0xa8] sm:$0xff]  ;;  %v39_v14 = vld [vmem:[#allocation2 + $0x20] sm:$0xff]  ;;  %v158_v26 = vmax.f32 %v53_v5, %v54_v6  ;;  %632 = vmatprep.mubr.msk.f32.mxu0 %vm699_vm0, %v698_v0  ;;  %vm234_vm5 = vcmask 392512   ;;  %vm241_vm6 = vcmask 458112  }
  0x12   :  { %68 = vadd.xlane.f32.xlu0 %v67_v7  ;;  %v70_v11 = vadd.f32 %v38_v9, %v37_v8  ;;  %v40_v15 = vld [vmem:[#allocation2 + $0x28] sm:$0xff]  ;;  %v97_v16 = vadd.f32 %v56_v13, %v55_v12  ;;  %v57_v18 = vld [vmem:[#allocation2 + $0xb0] sm:$0xff]  ;;  %v58_v19 = vld [vmem:[#allocation2 + $0xb8] sm:$0xff]  ;;  %v134_v24 = vmax.f32 %v37_v8, %v38_v9  ;;  %v161_v34 = vmax.f32 %v55_v12, %v56_v13 }
  0x13   :  { %v73_v17 = vadd.f32 %v40_v15, %v39_v14  ;;  %v41_v20 = vld [vmem:[#allocation2 + $0x30] sm:$0xff]  ;;  %v42_v21 = vld [vmem:[#allocation2 + $0x38] sm:$0xff]  ;;  %v100_v22 = vadd.f32 %v58_v19, %v57_v18  ;;  %v59_v28 = vld [vmem:[#allocation2 + $0xc0] sm:$0xff]  ;;  %v137_v35 = vmax.f32 %v39_v14, %v40_v15  ;;  %v164_v42 = vmax.f32 %v57_v18, %v58_v19  ;;  %637 = vmatprep.mubr.msk.f32.mxu1 %vm699_vm0, %v698_v0 }
  0x14   :  { %v76_v23 = vadd.f32 %v42_v21, %v41_v20  ;;  %v60_v29 = vld [vmem:[#allocation2 + $0xc8] sm:$0xff]  ;;  %v43_v30 = vld [vmem:[#allocation2 + $0x40] sm:$0xff]  ;;  %v61_v36 = vld [vmem:[#allocation2 + $0xd0] sm:$0xff]  ;;  %v140_v43 = vmax.f32 %v41_v20, %v42_v21  ;;  %vm248_vm7 = vcmask 523712   ;;  %vm289_vm8 = vcmask 1041409  }
  0x15   :  { %95 = vadd.xlane.f32.xlu1 %v94_v10  ;;  %v44_v31 = vld [vmem:[#allocation2 + $0x48] sm:$0xff]  ;;  %v103_v32 = vadd.f32 %v60_v29, %v59_v28  ;;  %v62_v37 = vld [vmem:[#allocation2 + $0xd8] sm:$0xff]  ;;  %v45_v38 = vld [vmem:[#allocation2 + $0x50] sm:$0xff]  ;;  %v167_v50 = vmax.f32 %v59_v28, %v60_v29  ;;  %vm386_vm9 = vcmask 1043459   ;;  %vm389_vm10 = vcmask 1041408  }
  0x16   :  { %71 = vadd.xlane.f32.xlu0 %v70_v11  ;;  %v79_v33 = vadd.f32 %v44_v31, %v43_v30  ;;  %v46_v39 = vld [vmem:[#allocation2 + $0x58] sm:$0xff]  ;;  %v106_v40 = vadd.f32 %v62_v37, %v61_v36  ;;  %v63_v44 = vld [vmem:[#allocation2 + $0xe0] sm:$0xff]  ;;  %v64_v45 = vld [vmem:[#allocation2 + $0xe8] sm:$0xff]  ;;  %v143_v51 = vmax.f32 %v43_v30, %v44_v31  ;;  %v170_v58 = vmax.f32 %v61_v36, %v62_v37 }
  0x17   :  { %v82_v41 = vadd.f32 %v46_v39, %v45_v38  ;;  %v47_v46 = vld [vmem:[#allocation2 + $0x60] sm:$0xff]  ;;  %v48_v47 = vld [vmem:[#allocation2 + $0x68] sm:$0xff]  ;;  %v109_v48 = vadd.f32 %v64_v45, %v63_v44  ;;  %v65_v52 = vld [vmem:[#allocation2 + $0xf0] sm:$0xff]  ;;  %v146_v59 = vmax.f32 %v45_v38, %v46_v39  ;;  %v173_v60 = vmax.f32 %v63_v44, %v64_v45 }
  0x18   :  { %v85_v49 = vadd.f32 %v48_v47, %v47_v46  ;;  %v66_v53 = vld [vmem:[#allocation2 + $0xf8] sm:$0xff]  ;;  %v49_v54 = vld [vmem:[#allocation2 + $0x70] sm:$0xff]  ;;  %v149_v61 = vmax.f32 %v47_v46, %v48_v47  ;;  %v396_v3 = vld [vmem:[%s883_s1 + $0x28] sm:$0xff]  ;;  %vm408_vm11 = vcmask 523264   ;;  %vm493_vm12 = vcmask 1043456  }
  0x19   :  { %98 = vadd.xlane.f32.xlu1 %v97_v16  ;;  %v50_v55 = vld [vmem:[#allocation2 + $0x78] sm:$0xff]  ;;  %v112_v56 = vadd.f32 %v66_v53, %v65_v52  ;;  %v176_v62 = vmax.f32 %v65_v52, %v66_v53  ;;  %v397_v2 = vld [vmem:[%s883_s1 + $0x30] sm:$0xff]  ;;  %v395_v4 = vld [vmem:[%s883_s1 + $0x20] sm:$0xff]  ;;  %vm489_vm13 = vcmask 31744   ;;  %vm577_vm14 = vcmask 516096  }
  0x1a   :  { %74 = vadd.xlane.f32.xlu0 %v73_v17  ;;  %v88_v57 = vadd.f32 %v50_v55, %v49_v54  ;;  %v152_v63 = vmax.f32 %v49_v54, %v50_v55  ;;  %v398_v1 = vld [vmem:[%s883_s1 + $0x38] sm:$0xff]  ;;  %v393_v6 = vld [vmem:[%s883_s1 + $0x10] sm:$0xff]  ;;  %v392_v7 = vld [vmem:[%s883_s1 + $0x8] sm:$0xff]  ;;  %vm580_vm15 = vcmask 517121  }
  0x1b   :  { %617 = vmatpush3.msra.mxu0 %v398_v1  ;;  %v394_v5 = vld [vmem:[%s883_s1 + $0x18] sm:$0xff]  ;;  %v391_v8 = vld [vmem:[%s883_s1] sm:$0xff] }
  0x1c   :  { %618 = vmatprep.subr.mxu0 %v698_v0 }
  0x1d   :  { %101 = vadd.xlane.f32.xlu1 %v100_v22  ;;  %619 = vmatpush3.msra.mxu0 %v397_v2 }
  0x1e   :  { %77 = vadd.xlane.f32.xlu0 %v76_v23  ;;  %620 = vmatprep.subr.mxu0 %v698_v0 }
  0x1f   :  { %621 = vmatpush3.msra.mxu0 %v396_v3 }
  0x20   :  { %622 = vmatprep.subr.mxu0 %v698_v0 }
  0x21   :  { %135 = vmax.xlane.f32.xlu1 %v134_v24  ;;  %623 = vmatpush3.msra.mxu0 %v395_v4 }
  0x22   :  { %132 = vmax.xlane.f32.xlu0 %v131_v25  ;;  %624 = vmatprep.subr.mxu0 %v698_v0  ;;  %v195_v25 = vlaneseq }
  0x23   :  { %625 = vmatpush3.msra.mxu0 %v394_v5 }
  0x24   :  { %626 = vmatprep.subr.mxu0 %v698_v0  ;;  %v196_v28 = vand.u32 127, %v195_v25  ;;  %v198_v29 = vshrl.u32 %v195_v25, 7 }
  0x25   :  { %159 = vmax.xlane.f32.xlu1 %v158_v26  ;;  %627 = vmatpush3.msra.mxu0 %v393_v6 }
  0x26   :  { %156 = vmax.xlane.f32.xlu0 %v155_v27  ;;  %628 = vmatprep.subr.mxu0 %v698_v0  ;;  %v201_v31 = vadd.s32 4294967288, %v196_v28  ;;  %v236_v47 = vadd.s32 4294967248, %v196_v28  ;;  %v243_v52 = vadd.s32 4294967240, %v196_v28 }
  0x27   :  { %629 = vmatpush3.msra.mxu0 %v392_v7 }
  0x28   :  { %630 = vmatprep.subr.mxu0 %v698_v0  ;;  %v778_v37 = vsub.s32 %v201_v31, %v198_v29  ;;  %v801_v3 = vsub.s32 %v243_v52, %v198_v29 }
  0x29   :  { %104 = vadd.xlane.f32.xlu1 %v103_v32  ;;  %631 = vmatpush3.msra.mxu0 %v391_v8  ;;  %v208_v32 = vadd.s32 4294967280, %v196_v28 }
  0x2a   :  { %80 = vadd.xlane.f32.xlu0 %v79_v33 }
  0x2b   :  { %v780_v39 = vsub.s32 %v208_v32, %v198_v29 }
  0x2d   :  { %162 = vmax.xlane.f32.xlu1 %v161_v34  ;;  %v215_v34 = vadd.s32 4294967272, %v196_v28 }
  0x2e   :  { %138 = vmax.xlane.f32.xlu0 %v137_v35  ;;  %v776_v35 = vsub.s32 %v196_v28, %v198_v29 }
  0x2f   :  { %v782_v46 = vsub.s32 %v215_v34, %v198_v29 }
  0x31   :  { %107 = vadd.xlane.f32.xlu1 %v106_v40 }
  0x32   :  { %83 = vadd.xlane.f32.xlu0 %v82_v41 }
  0x35   :  { %165 = vmax.xlane.f32.xlu1 %v164_v42  ;;  %v222_v42 = vadd.s32 4294967264, %v196_v28 }
  0x36   :  { %141 = vmax.xlane.f32.xlu0 %v140_v43  ;;  %v229_v43 = vadd.s32 4294967256, %v196_v28 }
  0x39   :  { %110 = vadd.xlane.f32.xlu1 %v109_v48 }
  0x3a   :  { %86 = vadd.xlane.f32.xlu0 %v85_v49 }
  0x3d   :  { %168 = vmax.xlane.f32.xlu1 %v167_v50 }
  0x3e   :  { %144 = vmax.xlane.f32.xlu0 %v143_v51 }
  0x41   :  { %113 = vadd.xlane.f32.xlu1 %v112_v56 }
  0x42   :  { %89 = vadd.xlane.f32.xlu0 %v88_v57  ;;  %v790_v57 = vsub.s32 %v222_v42, %v198_v29 }
  0x45   :  { %171 = vmax.xlane.f32.xlu1 %v170_v58 }
  0x46   :  { %147 = vmax.xlane.f32.xlu0 %v146_v59  ;;  %v792_v59 = vsub.s32 %v229_v43, %v198_v29 }
  0x49   :  { %174 = vmax.xlane.f32.xlu1 %v173_v60 }
  0x4a   :  { %150 = vmax.xlane.f32.xlu0 %v149_v61 }
  0x4d   :  { %177 = vmax.xlane.f32.xlu1 %v176_v62 }
  0x4e   :  { %153 = vmax.xlane.f32.xlu0 %v152_v63  ;;  %v796_v63 = vsub.s32 %v236_v47, %v198_v29 }
  0x9a   :  { %v93_v9 = vpop.xlane.xlu1 %92 }
  0x9b   :  { %v69_v10 = vpop.xlane.xlu0 %68  ;;  %v123_v44 = vmul.f32 0.00390625, %v93_v9 }
  0x9c   :  { %v115_v48 = vmul.f32 0.00390625, %v69_v10 }
  0x9d   :  { %v253_v60 = vrot.slane %v123_v44, %v776_v35 }
  0x9e   :  { %v96_v11 = vpop.xlane.xlu1 %95  ;;  %v200_v0 = vrot.slane %v115_v48, %v776_v35 }
  0x9f   :  { %v72_v12 = vpop.xlane.xlu0 %71  ;;  %v124_v38 = vmul.f32 0.00390625, %v96_v11 }
  0xa0   :  { %v116_v41 = vmul.f32 0.00390625, %v72_v12 }
  0xa1   :  { %v257_v53 = vrot.slane %v124_v38, %v778_v37 }
  0xa2   :  { %v99_v13 = vpop.xlane.xlu1 %98  ;;  %v205_v56 = vrot.slane %v116_v41, %v778_v37 }
  0xa3   :  { %v75_v14 = vpop.xlane.xlu0 %74  ;;  %v125_v45 = vmul.f32 0.00390625, %v99_v13  ;;  %v258_v5 = vsel %vm206_vm1, %v257_v53, %v253_v60 }
  0xa4   :  { %v117_v49 = vmul.f32 0.00390625, %v75_v14  ;;  %v207_v10 = vsel %vm206_vm1, %v205_v56, %v200_v0 }
  0xa5   :  { %v262_v61 = vrot.slane %v125_v45, %v780_v39 }
  0xa6   :  { %v102_v15 = vpop.xlane.xlu1 %101  ;;  %v212_v1 = vrot.slane %v117_v49, %v780_v39 }
  0xa7   :  { %v78_v16 = vpop.xlane.xlu0 %77  ;;  %v126_v50 = vmul.f32 0.00390625, %v102_v15  ;;  %v263_v14 = vsel %vm213_vm2, %v262_v61, %v258_v5 }
  0xa8   :  { %v118_v54 = vmul.f32 0.00390625, %v78_v16 }
  0xa9   :  { %v267_v2 = vrot.slane %v126_v50, %v782_v46 }
  0xaa   :  { %v760_v17 = vpop.xlane.xlu1 %135  ;;  %v219_v6 = vrot.slane %v118_v54, %v782_v46 }
  0xab   :  { %v762_v18 = vpop.xlane.xlu0 %132  ;;  %v315_v7 = vrot.slane %v760_v17, %v778_v37 }
  0xac   :  { %v311_v8 = vrot.slane %v762_v18, %v776_v35  ;;  %v214_v18 = vsel %vm213_vm2, %v212_v1, %v207_v10 }
  0xae   :  { %v764_v19 = vpop.xlane.xlu1 %159 }
  0xaf   :  { %v766_v20 = vpop.xlane.xlu0 %156  ;;  %v354_v11 = vrot.slane %v764_v19, %v778_v37  ;;  %v221_v19 = vsel %vm220_vm3, %v219_v6, %v214_v18 }
  0xb0   :  { %v350_v12 = vrot.slane %v766_v20, %v776_v35  ;;  %v316_v20 = vsel %vm206_vm1, %v315_v7, %v311_v8 }
  0xb2   :  { %v105_v21 = vpop.xlane.xlu1 %104  ;;  %v355_v34 = vsel %vm206_vm1, %v354_v11, %v350_v12  ;;  %v400_v11 = vld [vmem:[%s885_s3] sm:$0xf] }
  0xb3   :  { %v81_v22 = vpop.xlane.xlu0 %80  ;;  %v127_v58 = vmul.f32 0.00390625, %v105_v21  ;;  %v268_v21 = vsel %vm220_vm3, %v267_v2, %v263_v14  ;;  %636 = vmatpush3.msk.msra.mxu1 %vm493_vm12, %v400_v11 }
  0xb4   :  { %v119_v62 = vmul.f32 0.00390625, %v81_v22 }
  0xb5   :  { %v272_v13 = vrot.slane %v127_v58, %v790_v57 }
  0xb6   :  { %v768_v23 = vpop.xlane.xlu1 %162  ;;  %v226_v15 = vrot.slane %v119_v62, %v790_v57 }
  0xb7   :  { %v770_v24 = vpop.xlane.xlu0 %138  ;;  %v359_v29 = vrot.slane %v768_v23, %v780_v39 }
  0xb9   :  { %v360_v43 = vsel %vm213_vm2, %v359_v29, %v355_v34 }
  0xba   :  { %v108_v26 = vpop.xlane.xlu1 %107 }
  0xbb   :  { %v84_v27 = vpop.xlane.xlu0 %83  ;;  %v128_v16 = vmul.f32 0.00390625, %v108_v26  ;;  %v273_v26 = vsel %vm227_vm4, %v272_v13, %v268_v21 }
  0xbc   :  { %v120_v17 = vmul.f32 0.00390625, %v84_v27  ;;  %v320_v27 = vrot.slane %v770_v24, %v780_v39 }
  0xbd   :  { %v277_v37 = vrot.slane %v128_v16, %v792_v59  ;;  %v601_v16 = vld [vmem:[%s886_s4] ss:$0 sm:$0xff] }
  0xbe   :  { %v772_v30 = vpop.xlane.xlu1 %165  ;;  %v233_v38 = vrot.slane %v120_v17, %v792_v59 }
  0xbf   :  { %v774_v33 = vpop.xlane.xlu0 %141  ;;  %v364_v23 = vrot.slane %v772_v30, %v782_v46  ;;  %v278_v50 = vsel %vm234_vm5, %v277_v37, %v273_v26 }
  0xc1   :  { %v365_v52 = vsel %vm220_vm3, %v364_v23, %v360_v43 }
  0xc2   :  { %v111_v36 = vpop.xlane.xlu1 %110 }
  0xc3   :  { %v87_v40 = vpop.xlane.xlu0 %86  ;;  %v129_v22 = vmul.f32 0.00390625, %v111_v36  ;;  %v228_v36 = vsel %vm227_vm4, %v226_v15, %v221_v19 }
  0xc4   :  { %v121_v25 = vmul.f32 0.00390625, %v87_v40  ;;  %v325_v40 = vrot.slane %v774_v33, %v782_v46  ;;  %v321_v33 = vsel %vm213_vm2, %v320_v27, %v316_v20 }
  0xc5   :  { %v282_v41 = vrot.slane %v129_v22, %v796_v63 }
  0xc6   :  { %v784_v51 = vpop.xlane.xlu1 %168  ;;  %v240_v42 = vrot.slane %v121_v25, %v796_v63  ;;  %v326_v54 = vsel %vm220_vm3, %v325_v40, %v321_v33 }
  0xc7   :  { %v787_v55 = vpop.xlane.xlu0 %144  ;;  %v369_v24 = vrot.slane %v784_v51, %v790_v57  ;;  %v235_v51 = vsel %vm234_vm5, %v233_v38, %v228_v36 }
  0xc8   :  { %v330_v44 = vrot.slane %v787_v55, %v790_v57  ;;  %v283_v55 = vsel %vm241_vm6, %v282_v41, %v278_v50  ;;  %v242_v56 = vsel %vm241_vm6, %v240_v42, %v235_v51 }
  0xc9   :  { %v370_v57 = vsel %vm227_vm4, %v369_v24, %v365_v52 }
  0xca   :  { %v114_v4 = vpop.xlane.xlu1 %113 }
  0xcb   :  { %v90_v9 = vpop.xlane.xlu0 %89  ;;  %v130_v31 = vmul.f32 0.00390625, %v114_v4 }
  0xcc   :  { %v122_v35 = vmul.f32 0.00390625, %v90_v9 }
  0xcd   :  { %v287_v45 = vrot.slane %v130_v31, %v801_v3 }
  0xce   :  { %v172_v28 = vpop.xlane.xlu1 %171  ;;  %v247_v46 = vrot.slane %v122_v35, %v801_v3 }
  0xcf   :  { %v148_v32 = vpop.xlane.xlu0 %147  ;;  %v374_v30 = vrot.slane %v172_v28, %v792_v59  ;;  %v288_v60 = vsel %vm248_vm7, %v287_v45, %v283_v55 }
  0xd0   :  { %v335_v48 = vrot.slane %v148_v32, %v792_v59  ;;  %v331_v59 = vsel %vm227_vm4, %v330_v44, %v326_v54 }
  0xd1   :  { %v375_v61 = vsel %vm234_vm5, %v374_v30, %v370_v57 }
  0xd2   :  { %v175_v39 = vpop.xlane.xlu1 %174  ;;  %v336_v1 = vsel %vm234_vm5, %v335_v48, %v331_v59 }
  0xd3   :  { %v151_v47 = vpop.xlane.xlu0 %150  ;;  %v379_v49 = vrot.slane %v175_v39, %v796_v63 }
  0xd4   :  { %v340_v53 = vrot.slane %v151_v47, %v796_v63  ;;  %v249_v63 = vsel %vm248_vm7, %v247_v46, %v242_v56 }
  0xd5   :  { %v380_v2 = vsel %vm241_vm6, %v379_v49, %v375_v61  ;;  %v290_v8 = vsel %vm289_vm8, %v288_v60, %v249_v63 }
  0xd6   :  { %v178_v58 = vpop.xlane.xlu1 %177  ;;  %v341_v5 = vsel %vm241_vm6, %v340_v53, %v336_v1 }
  0xd7   :  { %v384_v62 = vrot.slane %v178_v58, %v801_v3  ;;  %v154_v0 = vpop.xlane.xlu0 %153 }
  0xd8   :  { %v345_v4 = vrot.slane %v154_v0, %v801_v3  ;;  %v599_v3 = vld [vmem:[%s884_s2] ss:$0 sm:$0xff]  ;;  %s700_s2 = smov [#allocation5]  }
  0xd9   :  { %v385_v6 = vsel %vm248_vm7, %v384_v62, %v380_v2  ;;  %s587_s3 = sshll.u32 %s700_s2, 4  ;;  %s588_s3 = int_to_ptr.vmem [resolvable:$true] %s587_s3 }
  0xda   :  { %v346_v7 = vsel %vm248_vm7, %v345_v4, %v341_v5  ;;  %s671_s20 = scalar_lea.vmem %s588_s3, 32  ;;  %p676_p6 = scmp.lt.s32.totalorder %s588_s3, %s588_s3 }
  0xdb   :  { %v387_v9 = vsel %vm386_vm9, %v385_v6, %v346_v7  ;;  %p672_p5 = scmp.ne.s32.totalorder %s588_s3, %s671_s20  ;;  %p677_p7 = scmp.lt.s32.totalorder %s671_s20, %s671_s20 }
  0xdc   :  { %v390_v10 = vsel %vm389_vm10, %v290_v8, %v387_v9 }
  0xdd   :  { %633 = vmatmul.mubr.msk.f32.vlgmr.msra.gmra.mxu0 %vm408_vm11, %v390_v10  ;;  %p678_p8 = por %p677_p7, %p676_p6 }
  0xdf   :  { %p679_p9 = pnand %p678_p8, %p672_p5 }
 0x19d   :  { %v478_v12 = vpop.f32.mrf.mxu0 }
 0x19e   :  { %v479_v13 = vadd.f32 %v599_v3, %v478_v12 }
 0x19f   :  { %v634_v14 = vpop.f32.mrf.mxu0 }
 0x1a0   :  { %v482_v15 = vmax.f32 %v479_v13, 0.0 }
 0x1a2   :  { %638 = vmatmul.mubr.msk.f32.vlgmr.msra.gmra.mxu1 %vm489_vm13, %v482_v15 }
 0x262   :  { %v563_v17 = vpop.f32.mrf.mxu1 }
 0x263   :  { %v564_v18 = vadd.f32 %v601_v16, %v563_v17 }
 0x264   :  { %v639_v21 = vpop.f32.mrf.mxu1 }
 0x265   :  { %v568_v22 = vrot.slane %v564_v18, 2 }
 0x267   :  { %v570_v25 = vadd.f32 %v568_v22, %v564_v18 }
 0x269   :  { %v604_v28 = vmul.f32 -1.442695, %v570_v25 }
 0x26b   :  { %647 = vpow2.f32 %v604_v28 }
 0x278   :  { %v648_v19 = vpop.eup %647 }
 0x279   :  { %v574_v20 = vadd.f32 1.0, %v648_v19 }
 0x27b   :  { %649 = vrcp.f32 %v574_v20 }
 0x288   :  { %v650_v29 = vpop.eup %649 }
 0x289   :  { %578 = vst.msk [vmem:[#allocation5] sm:$0x1] %vm577_vm14, %v650_v29 }
 0x28a   :  { %581 = vst.msk [vmem:[#allocation5] sm:$0x2] %vm580_vm15, %v650_v29 }
 0x28b   :  { %682 = shalt.err (!%p679_p9)
}
 0x28c   :  { %s701_s4 = smov 1  }
 0x28d   :  { %593 = dma.vmem_to_hbm [thread:$0]  %s588_s3, 32, %s887_s5, [#allocation4], %s697_s22, %s697_s22, %s701_s4  }
 0x28e   :  { %693 = dma.done.wait [#allocation4], 32  }
 0x28f   :  { %694 = vsyncadd [#allocation4], 4294967264 }
 0x290   :  { %597 = vsyncpa [#allocation3], 1 }
 0x291   :  { %598 = vsyncpa [#allocation4], 1 }

</bundles_post_ra>
